<compile_context>
chip_gen: v5e
topology: v5e:2x2
jax: 0.10.0
libtpu: 0.0.40
codegen_flags: <defaults>
</compile_context>

<pallas_src>
import functools

import jax
import jax.numpy as jnp
from jax.experimental import pallas as pl
from jax.experimental.pallas import tpu as pltpu

FEAT_DIM = 12
OUT_DIM = 3
PAD_OUT = 8       # MXU lhs rows padded to one sublane group
LANE = 128


def _gauge_decoder_kernel(x_ref, w_ref, b_ref, o_ref):
    # x_ref: (TN, F)      f32 VMEM  -- native [N, F] row block (samples on sublanes)
    # w_ref: (8, F)       f32 VMEM  -- torch Linear weight, rows 3..7 zero-padded
    # b_ref: (8, 1)       f32 VMEM  -- bias column, rows 3..7 zero-padded
    # o_ref: (3, TN)      f32 VMEM  -- lane-dense output block (samples on lanes)
    y = jax.lax.dot_general(
        w_ref[...], x_ref[...],
        dimension_numbers=(((1,), (1,)), ((), ())),   # contract the feature axis
        preferred_element_type=jnp.float32,
    )                                                 # (8, TN) on the MXU
    y = y + b_ref[...]                                # (8, 1) broadcast over lanes
    act = 0.5 * jnp.tanh(0.5 * y)                     # == sigmoid(y) - 0.5
    o_ref[...] = act[:OUT_DIM, :]


@functools.partial(jax.jit, static_argnames=("tile_n",))
def gauge_decoder_pallas_t(features, weight, bias, *, tile_n=16384):
    """features: [N, F] f32; weight: [3, F] (torch layout); bias: [3] -> [3, N]."""
    n, f = features.shape
    assert f == FEAT_DIM, "feat_dim mismatch"

    x = features.astype(jnp.float32)                                    # [N, F], native
    w = weight.reshape(OUT_DIM, FEAT_DIM).astype(jnp.float32)
    b = bias.reshape(OUT_DIM).astype(jnp.float32)
    # Pad the tiny parameters to a full sublane group (one-time, trivial cost).
    w8 = jnp.zeros((PAD_OUT, FEAT_DIM), jnp.float32).at[:OUT_DIM].set(w)
    b8 = jnp.zeros((PAD_OUT, 1), jnp.float32).at[:OUT_DIM, 0].set(b)

    # Tile the sample axis.  TN is a multiple of 128 unless one block covers all
    # of N (then block dim == full array dim, which is also a legal block shape).
    n128 = ((n + LANE - 1) // LANE) * LANE
    tn = max(LANE, min(int(tile_n), n128))
    tn = ((tn + LANE - 1) // LANE) * LANE
    if tn > n:
        tn = n                                   # single full-extent block
    # Megacore (v7x) only: aim for several parallel steps so both TensorCores
    # stay balanced.  No-op on single-TC chips (v5e/v6e) where splitting would
    # just add per-step overhead.
    num_cores = getattr(jax.devices()[0], "num_cores", 1)
    if num_cores > 1 and tn < n:
        min_steps = 4 * num_cores
        if pl.cdiv(n, tn) < min_steps and n >= min_steps * LANE:
            tn = ((pl.cdiv(n, min_steps) + LANE - 1) // LANE) * LANE

    grid = (pl.cdiv(n, tn),)
    cost = pl.CostEstimate(
        flops=2 * n * FEAT_DIM * OUT_DIM,
        transcendentals=n * OUT_DIM,
        bytes_accessed=n * 4 * (FEAT_DIM + OUT_DIM),
    )

    out_t = pl.pallas_call(
        _gauge_decoder_kernel,
        out_shape=jax.ShapeDtypeStruct((OUT_DIM, n), jnp.float32),
        grid_spec=pltpu.PrefetchScalarGridSpec(
            num_scalar_prefetch=0,
            grid=grid,
            in_specs=[
                pl.BlockSpec((tn, FEAT_DIM), lambda i: (i, 0)),        # features rows
                pl.BlockSpec((PAD_OUT, FEAT_DIM), lambda i: (0, 0)),   # weight (resident)
                pl.BlockSpec((PAD_OUT, 1), lambda i: (0, 0)),          # bias column
            ],
            out_specs=pl.BlockSpec((OUT_DIM, tn), lambda i: (0, i)),   # [3, N] lane-dense
        ),
        compiler_params=pltpu.CompilerParams(
            dimension_semantics=("parallel",),
            vmem_limit_bytes=40 * 1024 * 1024,
        ),
        cost_estimate=cost,
    )(x, w8, b8)
    return out_t                                                        # [3, N]


def gauge_decoder_pallas(features, weight, bias, *, tile_n=16384):
    """PyTorch-facing wrapper: [N, F] -> [N, 3].

    The final [3, N] -> [N, 3] transpose is pure layout plumbing for the torch
    signature (24 B/sample); downstream code that can consume [3, N] should use
    gauge_decoder_pallas_t directly and avoid it.
    """
    return gauge_decoder_pallas_t(features, weight, bias, tile_n=tile_n).T


def gauge_decoder_reference(features, weight, bias):
    y = features @ weight.T + bias
    return jax.nn.sigmoid(y) - 0.5


if __name__ == "__main__":
    key = jax.random.PRNGKey(0)

    # Parameters exactly as the PyTorch __init__ sets them: constant 0.
    N = 300  # deliberately not a multiple of 128 to exercise edge clipping
    features = jax.random.normal(key, (N, FEAT_DIM), dtype=jnp.float32)
    weight = jnp.zeros((OUT_DIM, FEAT_DIM), dtype=jnp.float32)  # torch Linear [out, in]
    bias = jnp.zeros((OUT_DIM,), dtype=jnp.float32)

    out = jax.block_until_ready(gauge_decoder_pallas(features, weight, bias))
    ref = gauge_decoder_reference(features, weight, bias)
    assert out.shape == (N, OUT_DIM)
    assert jnp.allclose(out, ref, atol=1e-6), "Pallas kernel mismatch (zero weights)"

    # Non-trivial weights + multi-step grid with a ragged last block.
    k1, k2, k3 = jax.random.split(key, 3)
    N2 = 1000
    feats2 = jax.random.normal(k1, (N2, FEAT_DIM), dtype=jnp.float32)
    w_rand = jax.random.normal(k2, (OUT_DIM, FEAT_DIM), dtype=jnp.float32) * 0.3
    b_rand = jax.random.normal(k3, (OUT_DIM,), dtype=jnp.float32) * 0.3
    out2 = jax.block_until_ready(
        gauge_decoder_pallas(feats2, w_rand, b_rand, tile_n=256))
    ref2 = gauge_decoder_reference(feats2, w_rand, b_rand)
    assert out2.shape == (N2, OUT_DIM)
    assert jnp.allclose(out2, ref2, atol=1e-5, rtol=1e-5), \
        "Pallas kernel mismatch (random weights)"

    print("KERNEL_OK")
</pallas_src>

<mosaic_0001>
module attributes {stable_mosaic.version = 11 : i64} {
  func.func @_gauge_decoder_kernel(%arg0: i32, %arg1: memref<300x12xf32, #tpu.memory_space<vmem>>, %arg2: memref<8x12xf32, #tpu.memory_space<vmem>>, %arg3: memref<8x1xf32, #tpu.memory_space<vmem>>, %arg4: memref<3x300xf32, #tpu.memory_space<vmem>>) attributes {dimension_semantics = [#tpu.dimension_semantics<parallel>], iteration_bounds = array<i64: 1>, scalar_prefetch = 0 : i64, scratch_operands = 0 : i64, tpu.core_type = #tpu.core_type<tc>, window_params = [{transform_indices = @transform_0, window_bounds = array<i64: 300, 12>}, {pipeline_mode = #tpu.pipeline_mode<synchronous>, transform_indices = @transform_1, window_bounds = array<i64: 8, 12>}, {pipeline_mode = #tpu.pipeline_mode<synchronous>, transform_indices = @transform_2, window_bounds = array<i64: 8, 1>}, {transform_indices = @transform_3, window_bounds = array<i64: 3, 300>}]} {
    %c0 = arith.constant 0 : index
    %c0_0 = arith.constant 0 : index
    %0 = vector.load %arg2[%c0, %c0_0] : memref<8x12xf32, #tpu.memory_space<vmem>>, vector<8x12xf32>
    %c0_1 = arith.constant 0 : index
    %c0_2 = arith.constant 0 : index
    %1 = vector.load %arg1[%c0_1, %c0_2] : memref<300x12xf32, #tpu.memory_space<vmem>>, vector<300x12xf32>
    %cst = arith.constant dense<0.000000e+00> : vector<8x300xf32>
    %2 = tpu.matmul %0, %1, %cst {dimension_numbers = #tpu.dot_dimension_numbers<[1], [1], [0], [0], [0, 0, 1, 0], [], []>} : vector<8x12xf32>, vector<300x12xf32>, vector<8x300xf32> -> vector<8x300xf32>
    %c0_3 = arith.constant 0 : index
    %c0_4 = arith.constant 0 : index
    %3 = vector.load %arg3[%c0_3, %c0_4] : memref<8x1xf32, #tpu.memory_space<vmem>>, vector<8x1xf32>
    %4 = vector.broadcast %3 : vector<8x1xf32> to vector<8x300xf32>
    %5 = arith.addf %2, %4 : vector<8x300xf32>
    %cst_5 = arith.constant 5.000000e-01 : f32
    %6 = vector.broadcast %cst_5 : f32 to vector<8x300xf32>
    %7 = arith.mulf %6, %5 : vector<8x300xf32>
    %8 = math.tanh %7 : vector<8x300xf32>
    %cst_6 = arith.constant 5.000000e-01 : f32
    %9 = vector.broadcast %cst_6 : f32 to vector<8x300xf32>
    %10 = arith.mulf %9, %8 : vector<8x300xf32>
    %11 = vector.extract_strided_slice %10 {offsets = [0, 0], sizes = [3, 300], strides = [1, 1]} : vector<8x300xf32> to vector<3x300xf32>
    %c0_7 = arith.constant 0 : index
    %c0_8 = arith.constant 0 : index
    %12 = vector.load %arg4[%c0_7, %c0_8] : memref<3x300xf32, #tpu.memory_space<vmem>>, vector<3x300xf32>
    tpu.vector_store %arg4[%c0_7, %c0_8], %11 {strides = array<i32>} : memref<3x300xf32, #tpu.memory_space<vmem>>, vector<3x300xf32>,
    return
  }
  func.func @transform_0(%arg0: i32) -> (i32, i32) {
    %c0_i32 = arith.constant 0 : i32
    %c0_i32_0 = arith.constant 0 : i32
    return %arg0, %c0_i32 : i32, i32
  }
  func.func @transform_1(%arg0: i32) -> (i32, i32) {
    %c0_i32 = arith.constant 0 : i32
    %c0_i32_0 = arith.constant 0 : i32
    %c0_i32_1 = arith.constant 0 : i32
    return %c0_i32, %c0_i32_0 : i32, i32
  }
  func.func @transform_2(%arg0: i32) -> (i32, i32) {
    %c0_i32 = arith.constant 0 : i32
    %c0_i32_0 = arith.constant 0 : i32
    %c0_i32_1 = arith.constant 0 : i32
    return %c0_i32, %c0_i32_0 : i32, i32
  }
  func.func @transform_3(%arg0: i32) -> (i32, i32) {
    %c0_i32 = arith.constant 0 : i32
    %c0_i32_0 = arith.constant 0 : i32
    return %c0_i32, %arg0 : i32, i32
  }
}

</mosaic_0001>

<bundles_post_ra>
// kernel: gauge_decoder_pallas_t.1
= control target key start
LH: loop header
LB: loop body
LE: loop exit
PB: predicated region body
PF: predicated region fallthrough
CT: control target
= control target key end

     0   :  { %vm60_vm0 = vcmask 97280   ;;  %s534_s0 = inlined_call_operand.vmem [shape: f32[300,12], index: 0, kind: input, shape index: {}]   ;;  %s535_s1 = inlined_call_operand.vmem [shape: f32[8,12], index: 1, kind: input, shape index: {}]   ;;  %s536_s2 = inlined_call_operand.vmem [shape: f32[8,1], index: 2, kind: input, shape index: {}]   ;;  %s537_s3 = inlined_call_operand.hbm [shape: f32[3,300], index: 3, kind: output, shape index: {}]  }
   0x1   :  { %v31_v0 = vld [vmem:[%s534_s0 + $0x78] sm:$0xff]  ;;  %v30_v2 = vld [vmem:[%s534_s0 + $0x70] sm:$0xff]  ;;  %v29_v4 = vld [vmem:[%s534_s0 + $0x68] sm:$0xff] }
   0x2   :  { %v47_v1 = vld [vmem:[%s534_s0 + $0xf8] sm:$0xff]  ;;  %272 = vmatpush.xpose.msk.msra.mxu0 %vm60_vm0, %v31_v0  ;;  %v46_v3 = vld [vmem:[%s534_s0 + $0xf0] sm:$0xff]  ;;  %v45_v5 = vld [vmem:[%s534_s0 + $0xe8] sm:$0xff] }
   0x3   :  { %289 = vmatpush.xpose.msk.msra.mxu1 %vm60_vm0, %v47_v1  ;;  %v53_v6 = vld [vmem:[%s534_s0 + $0x128] sm:$0xf] }
   0x4   :  { %306 = vmatpush.xpose.msk.msra.mxu2 %vm60_vm0, %v53_v6 }
   0x6   :  { %273 = vmatpush.xpose.msk.msra.mxu0 %vm60_vm0, %v30_v2 }
   0x7   :  { %290 = vmatpush.xpose.msk.msra.mxu1 %vm60_vm0, %v46_v3 }
   0x8   :  { %8 = vsyncpa [#allocation3], 0  ;;  %v52_v7 = vld [vmem:[%s534_s0 + $0x120] sm:$0xff]  ;;  %v51_v10 = vld [vmem:[%s534_s0 + $0x118] sm:$0xff]  ;;  %v348_v28 = vmov 0   ;;  %vm254_vm1 = vcmask 354304  }
   0x9   :  { %v28_v8 = vld [vmem:[%s534_s0 + $0x60] sm:$0xff]  ;;  %307 = vmatpush.xpose.msk.msra.mxu2 %vm60_vm0, %v52_v7  ;;  %v27_v11 = vld [vmem:[%s534_s0 + $0x58] sm:$0xff]  ;;  %v50_v13 = vld [vmem:[%s534_s0 + $0x110] sm:$0xff]  ;;  %315 = vset.pattern.permute.xlu0 %v348_v28  ;;  %s263_s11 = sshll.u32 %s537_s3, 4  ;;  %vm250_vm2 = vcmask 1043456   ;;  %s264_s11 = int_to_ptr.hbm [resolvable:$true] %s263_s11 }
   0xa   :  { %274 = vmatpush.xpose.msk.msra.mxu0 %vm60_vm0, %v29_v4  ;;  %v44_v9 = vld [vmem:[%s534_s0 + $0xe0] sm:$0xff]  ;;  %v43_v12 = vld [vmem:[%s534_s0 + $0xd8] sm:$0xff]  ;;  %v26_v14 = vld [vmem:[%s534_s0 + $0x50] sm:$0xff] }
   0xb   :  { %291 = vmatpush.xpose.msk.msra.mxu1 %vm60_vm0, %v45_v5  ;;  %v42_v15 = vld [vmem:[%s534_s0 + $0xd0] sm:$0xff]  ;;  %v49_v16 = vld [vmem:[%s534_s0 + $0x108] sm:$0xff]  ;;  %v48_v19 = vld [vmem:[%s534_s0 + $0x100] sm:$0xff] }
   0xc   :  { %v25_v17 = vld [vmem:[%s534_s0 + $0x48] sm:$0xff]  ;;  %v24_v20 = vld [vmem:[%s534_s0 + $0x40] sm:$0xff]  ;;  %v23_v23 = vld [vmem:[%s534_s0 + $0x38] sm:$0xff] }
   0xd   :  { %308 = vmatpush.xpose.msk.msra.mxu2 %vm60_vm0, %v51_v10  ;;  %v41_v18 = vld [vmem:[%s534_s0 + $0xc8] sm:$0xff]  ;;  %v40_v21 = vld [vmem:[%s534_s0 + $0xc0] sm:$0xff]  ;;  %v39_v24 = vld [vmem:[%s534_s0 + $0xb8] sm:$0xff] }
   0xe   :  { %275 = vmatpush.xpose.msk.msra.mxu0 %vm60_vm0, %v28_v8  ;;  %v15_v22 = vld [vmem:[%s535_s1] sm:$0xff]  ;;  %v22_v26 = vld [vmem:[%s534_s0 + $0x30] sm:$0xff]  ;;  %v21_v29 = vld [vmem:[%s534_s0 + $0x28] sm:$0xff] }
   0xf   :  { %292 = vmatpush.xpose.msk.msra.mxu1 %vm60_vm0, %v44_v9  ;;  %v54_v25 = vld [vmem:[%s536_s2] sm:$0xff]  ;;  %v38_v27 = vld [vmem:[%s534_s0 + $0xb0] sm:$0xff]  ;;  %v37_v30 = vld [vmem:[%s534_s0 + $0xa8] sm:$0xff] }
  0x10   :  { %57 = vperm.xlu0 %315, %v54_v25   ;;  %v20_v31 = vld [vmem:[%s534_s0 + $0x20] sm:$0xff]  ;;  %v19_v33 = vld [vmem:[%s534_s0 + $0x18] sm:$0xff]  ;;  %v18_v35 = vld [vmem:[%s534_s0 + $0x10] sm:$0xff] }
  0x11   :  { %309 = vmatpush.xpose.msk.msra.mxu2 %vm60_vm0, %v50_v13  ;;  %v36_v32 = vld [vmem:[%s534_s0 + $0xa0] sm:$0xff]  ;;  %v35_v34 = vld [vmem:[%s534_s0 + $0x98] sm:$0xff]  ;;  %v34_v36 = vld [vmem:[%s534_s0 + $0x90] sm:$0xff] }
  0x12   :  { %276 = vmatpush.xpose.msk.msra.mxu0 %vm60_vm0, %v27_v11  ;;  %v17_v37 = vld [vmem:[%s534_s0 + $0x8] sm:$0xff]  ;;  %v16_v39 = vld [vmem:[%s534_s0] sm:$0xff] }
  0x13   :  { %293 = vmatpush.xpose.msk.msra.mxu1 %vm60_vm0, %v43_v12  ;;  %v33_v38 = vld [vmem:[%s534_s0 + $0x88] sm:$0xff]  ;;  %v32_v40 = vld [vmem:[%s534_s0 + $0x80] sm:$0xff]  ;;  %s349_s0 = smov [#allocation2]  }
  0x14   :  { %s261_s9 = sshll.u32 %s349_s0, 4  ;;  %s262_s9 = int_to_ptr.vmem [resolvable:$true] %s261_s9 }
  0x15   :  { %310 = vmatpush.xpose.msk.msra.mxu2 %vm60_vm0, %v49_v16 }
  0x16   :  { %277 = vmatpush.xpose.msk.msra.mxu0 %vm60_vm0, %v26_v14 }
  0x17   :  { %294 = vmatpush.xpose.msk.msra.mxu1 %vm60_vm0, %v42_v15 }
  0x19   :  { %311 = vmatpush.xpose.msk.msra.mxu2 %vm60_vm0, %v48_v19 }
  0x1a   :  { %278 = vmatpush.xpose.msk.msra.mxu0 %vm60_vm0, %v25_v17 }
  0x1b   :  { %295 = vmatpush.xpose.msk.msra.mxu1 %vm60_vm0, %v41_v18 }
  0x1c   :  { %312 = vmatmul.msk.f32.vlgmr.msra.gmra.mxu2 %vm60_vm0, %v15_v22 }
  0x1e   :  { %279 = vmatpush.xpose.msk.msra.mxu0 %vm60_vm0, %v24_v20 }
  0x1f   :  { %296 = vmatpush.xpose.msk.msra.mxu1 %vm60_vm0, %v40_v21 }
  0x22   :  { %280 = vmatpush.xpose.msk.msra.mxu0 %vm60_vm0, %v23_v23 }
  0x23   :  { %297 = vmatpush.xpose.msk.msra.mxu1 %vm60_vm0, %v39_v24 }
  0x26   :  { %281 = vmatpush.xpose.msk.msra.mxu0 %vm60_vm0, %v22_v26 }
  0x27   :  { %298 = vmatpush.xpose.msk.msra.mxu1 %vm60_vm0, %v38_v27 }
  0x2a   :  { %282 = vmatpush.xpose.msk.msra.mxu0 %vm60_vm0, %v21_v29 }
  0x2b   :  { %299 = vmatpush.xpose.msk.msra.mxu1 %vm60_vm0, %v37_v30 }
  0x2e   :  { %283 = vmatpush.xpose.msk.msra.mxu0 %vm60_vm0, %v20_v31 }
  0x2f   :  { %300 = vmatpush.xpose.msk.msra.mxu1 %vm60_vm0, %v36_v32 }
  0x32   :  { %284 = vmatpush.xpose.msk.msra.mxu0 %vm60_vm0, %v19_v33 }
  0x33   :  { %301 = vmatpush.xpose.msk.msra.mxu1 %vm60_vm0, %v35_v34 }
  0x36   :  { %285 = vmatpush.xpose.msk.msra.mxu0 %vm60_vm0, %v18_v35 }
  0x37   :  { %302 = vmatpush.xpose.msk.msra.mxu1 %vm60_vm0, %v34_v36 }
  0x3a   :  { %286 = vmatpush.xpose.msk.msra.mxu0 %vm60_vm0, %v17_v37 }
  0x3b   :  { %303 = vmatpush.xpose.msk.msra.mxu1 %vm60_vm0, %v33_v38 }
  0x3e   :  { %287 = vmatpush.xpose.msk.msra.mxu0 %vm60_vm0, %v16_v39 }
  0x3f   :  { %304 = vmatpush.xpose.msk.msra.mxu1 %vm60_vm0, %v32_v40 }
  0x41   :  { %288 = vmatmul.msk.f32.vlgmr.msra.gmra.mxu0 %vm60_vm0, %v15_v22 }
  0x42   :  { %305 = vmatmul.msk.f32.vlgmr.msra.gmra.mxu1 %vm60_vm0, %v15_v22 }
  0x82   :  { %v58_v41 = vpop.permute.xlu0 %57 }
  0x9f   :  { %v235_v42 = vpop.f32.mrf.mxu2 }
  0xa0   :  { %v236_v43 = vadd.f32 %v235_v42, %v58_v41 }
  0xa2   :  { %v240_v44 = vmul.f32 0.5, %v236_v43 }
  0xa4   :  { %316 = vtanh.f32 %v240_v44 }
  0xaa   :  { %v317_v45 = vpop.eup %316 }
  0xab   :  { %v246_v46 = vmul.f32 0.5, %v317_v45 }
  0xad   :  { %255 = vst.msk [vmem:[#allocation2 + $0x8] sm:$0x7] %vm254_vm1, %v246_v46 }
  0xbe   :  { %v195_v47 = vpop.f32.mrf.mxu0 }
  0xbf   :  { %v215_v48 = vpop.f32.mrf.mxu1  ;;  %v196_v49 = vadd.f32 %v195_v47, %v58_v41 }
  0xc0   :  { %v216_v50 = vadd.f32 %v215_v48, %v58_v41 }
  0xc1   :  { %v238_v51 = vmul.f32 0.5, %v196_v49 }
  0xc2   :  { %v239_v52 = vmul.f32 0.5, %v216_v50 }
  0xc3   :  { %318 = vtanh.f32 %v238_v51 }
  0xc4   :  { %320 = vtanh.f32 %v239_v52 }
  0xc9   :  { %v319_v53 = vpop.eup %318 }
  0xca   :  { %v321_v54 = vpop.eup %320  ;;  %v244_v56 = vmul.f32 0.5, %v319_v53 }
  0xcb   :  { %v245_v55 = vmul.f32 0.5, %v321_v54 }
  0xcd   :  { %v249_v57 = vrot.slane %v245_v55, 4 }
  0xcf   :  { %v251_v58 = vsel %vm250_vm2, %v244_v56, %v249_v57 }
  0xd0   :  { %253 = vst [vmem:[#allocation2] sm:$0x77] %v251_v58 }
  0xd1   :  { %266 = dma.vmem_to_hbm [thread:$0]  %s262_s9, 192, %s264_s11, [#allocation3]  }
  0xd2   :  { %346 = dma.done.wait [#allocation3], 192  }
  0xd3   :  { %347 = vsyncadd [#allocation3], 4294967104 }
  0xd4   :  { %271 = vsyncpa [#allocation3], 1 }

</bundles_post_ra>
